<compile_context>
chip_gen: v6e
topology: v6e:2x2x1
jax: 0.10.0
libtpu: 0.0.40
codegen_flags: <defaults>
</compile_context>

<pallas_src>
import functools

import jax
import jax.numpy as jnp
from jax.experimental import pallas as pl
from jax.experimental.pallas import tpu as pltpu


# Lookup tables, kept only for the pure-JAX reference check; the kernels bake
# the same values in as compile-time compares.
MAP_OPTION_0 = jnp.array(
    [[0, 0, 0, 0],
     [1, 0, 0, 0],
     [0, 1, 0, 0],
     [0, 0, 1, 0],
     [0, 0, 0, 1],
     [1, 0, 0, 0],
     [0, 1, 0, 0],
     [0, 0, 1, 0],
     [0, 0, 0, 1]], dtype=jnp.float32)          # (9, 4)

MAP_OPTION_1 = jnp.array(
    [[0.0],
     [1.0],
     [-1.0]], dtype=jnp.float32)                # (3, 1)


_B_TILE_TARGET = 64          # sublane dim target (multiple of 8 / 16 / 32)


def _device_kind() -> str:
    try:
        return jax.devices()[0].device_kind.lower()
    except Exception:
        return ""


def _l_tile_target(kind: str) -> int:
    # v7x: bigger tiles amortize the ~0.35 us/step pipeline overhead (its HBM is
    # ~3.2 TB/s so each step is short); footprint stays far under scoped VMEM.
    return 8192 if "v7" in kind else 2048


def _pick_tile(full: int, target: int, quantum: int) -> int:
    """Tile size: the full dim if it is small (always a legal block shape),
    otherwise the largest quantum-aligned tile <= target (grid uses cdiv, so
    unaligned trailing blocks are handled by Pallas bounds masking)."""
    if full <= target:
        return full
    return max((target // quantum) * quantum, quantum)


def _ensure_two_grid_steps(bt: int, lt: int, b: int, l: int):
    """On multi-TensorCore chips (v7x), make sure a 'parallel' grid axis has at
    least two steps so both cores get work.  No-op for tiny inputs."""
    if pl.cdiv(b, bt) * pl.cdiv(l, lt) >= 2:
        return bt, lt
    if lt >= 256 and lt % 256 == 0:
        return bt, lt // 2
    if bt >= 16 and bt % 16 == 0:
        return bt // 2, lt
    return bt, lt


def _onehot4_pack_kernel(x_ref, o_ref):
    """option 0: pack the four one-hot channels of each position into one int32
    (byte c holds channel c).  All loads/compares/stores are dense (Bt, Lt)."""
    x = x_ref[...].astype(jnp.int32)                 # widen in-register
    v = jnp.zeros(x.shape, jnp.int32)
    for c in range(4):                               # tiny static unroll
        hit = ((x == (c + 1)) | (x == (c + 5))).astype(jnp.int32)
        v = v | (hit << (8 * c))
    o_ref[...] = v


def _signed_kernel(x_ref, o_ref):
    """option 1: x in {0,1,2} -> {0.0, 1.0, -1.0}; dense (Bt, Lt) store."""
    x = x_ref[...].astype(jnp.int32)
    o_ref[...] = jnp.where(x == 1, 1.0,
                           jnp.where(x == 2, -1.0, 0.0)).astype(o_ref.dtype)


def preprocessor_forward(x, option: int = 0, out_dtype=jnp.float32):
    """Pallas equivalent of Preprocessor(option).forward(x).

    x: integer codes, any rank (last dim = sequence); 0..8 for option 0,
       0..2 for option 1.  Native int8/int32 codes stream directly (no upcast).
    returns: x.shape + (C,) in out_dtype (default float32, like the module).
    """
    if not jnp.issubdtype(x.dtype, jnp.integer):
        # TODO(synk): PyTorch integer indexing would raise on non-integer x;
        # here we truncate to int32 instead.
        x = x.astype(jnp.int32)

    orig_shape = x.shape
    if x.ndim == 1:
        x2 = x[None, :]
    elif x.ndim == 2:
        x2 = x
    else:
        x2 = x.reshape(-1, orig_shape[-1])
    B, L = x2.shape

    kind = _device_kind()
    Bt = _pick_tile(B, _B_TILE_TARGET, 8)
    Lt = _pick_tile(L, _l_tile_target(kind), 128)
    if "v7" in kind:
        Bt, Lt = _ensure_two_grid_steps(Bt, Lt, B, L)
    grid = (pl.cdiv(B, Bt), pl.cdiv(L, Lt))

    cparams = pltpu.CompilerParams(
        dimension_semantics=("parallel", "parallel"),
        vmem_limit_bytes=32 * 1024 * 1024,           # >= every per-gen need here
    )
    x_spec = pl.BlockSpec((Bt, Lt), lambda i, j: (i, j))
    o_spec = pl.BlockSpec((Bt, Lt), lambda i, j: (i, j))
    in_bytes = x2.size * x2.dtype.itemsize

    if option == 0:
        packed = pl.pallas_call(
            _onehot4_pack_kernel,
            out_shape=jax.ShapeDtypeStruct((B, L), jnp.int32),
            grid=grid,
            in_specs=[x_spec],
            out_specs=o_spec,
            compiler_params=cparams,
            cost_estimate=pl.CostEstimate(
                flops=0, transcendentals=0,
                bytes_accessed=in_bytes + x2.size * 4),
        )(x2)
        # Single fused XLA elementwise pass: shift/mask/convert -> (B, L, 4).
        shifts = jnp.arange(4, dtype=jnp.int32) * 8
        y = ((packed[:, :, None] >> shifts) & 1).astype(out_dtype)
        return y.reshape(*orig_shape, 4)
    else:
        out_itemsize = jnp.dtype(out_dtype).itemsize
        y = pl.pallas_call(
            _signed_kernel,
            out_shape=jax.ShapeDtypeStruct((B, L), out_dtype),
            grid=grid,
            in_specs=[x_spec],
            out_specs=o_spec,
            compiler_params=cparams,
            cost_estimate=pl.CostEstimate(
                flops=0, transcendentals=0,
                bytes_accessed=in_bytes + x2.size * out_itemsize),
        )(x2)
        return y.reshape(*orig_shape, 1)


def _reference(x, option: int = 0):
    m = MAP_OPTION_0 if option == 0 else MAP_OPTION_1
    return jnp.take(m, x.astype(jnp.int32), axis=0)


if __name__ == "__main__":
    key = jax.random.PRNGKey(0)
    k0, k1, k2, k3 = jax.random.split(key, 4)

    fwd0 = jax.jit(functools.partial(preprocessor_forward, option=0))
    fwd1 = jax.jit(functools.partial(preprocessor_forward, option=1))

    # option 0, small int32 codes -> 4-channel one-hot
    x0 = jax.random.randint(k0, (2, 16), 0, 9, dtype=jnp.int32)
    y0 = jax.block_until_ready(fwd0(x0))
    assert y0.shape == (2, 16, 4) and y0.dtype == jnp.float32
    assert jnp.array_equal(y0, _reference(x0, 0))

    # option 1, small int32 codes -> scalar {0, 1, -1}
    x1 = jax.random.randint(k1, (2, 16), 0, 3, dtype=jnp.int32)
    y1 = jax.block_until_ready(fwd1(x1))
    assert y1.shape == (2, 16, 1) and y1.dtype == jnp.float32
    assert jnp.array_equal(y1, _reference(x1, 1))

    # option 0, native int8 codes (no wrapper upcast), lane-aligned L
    x2 = jax.random.randint(k2, (4, 256), 0, 9, dtype=jnp.int32).astype(jnp.int8)
    y2 = jax.block_until_ready(fwd0(x2))
    assert y2.shape == (4, 256, 4) and y2.dtype == jnp.float32
    assert jnp.array_equal(y2, _reference(x2, 0))

    # option 1, 3-D input (arbitrary leading batch dims, like torch fancy indexing)
    x3 = jax.random.randint(k3, (2, 3, 16), 0, 3, dtype=jnp.int32)
    y3 = jax.block_until_ready(fwd1(x3))
    assert y3.shape == (2, 3, 16, 1) and y3.dtype == jnp.float32
    assert jnp.array_equal(y3, _reference(x3, 1))

    print("KERNEL_OK")
</pallas_src>

<mosaic_0001>
module attributes {stable_mosaic.version = 11 : i64} {
  func.func @_onehot4_pack_kernel(%arg0: i32, %arg1: i32, %arg2: memref<2x16xi32, #tpu.memory_space<vmem>>, %arg3: memref<2x16xi32, #tpu.memory_space<vmem>>) attributes {dimension_semantics = [#tpu.dimension_semantics<parallel>, #tpu.dimension_semantics<parallel>], iteration_bounds = array<i64: 1, 1>, scalar_prefetch = 0 : i64, scratch_operands = 0 : i64, tpu.core_type = #tpu.core_type<tc>, window_params = [{transform_indices = @transform_0, window_bounds = array<i64: 2, 16>}, {transform_indices = @transform_1, window_bounds = array<i64: 2, 16>}]} {
    %c0 = arith.constant 0 : index
    %c0_0 = arith.constant 0 : index
    %0 = vector.load %arg2[%c0, %c0_0] : memref<2x16xi32, #tpu.memory_space<vmem>>, vector<2x16xi32>
    %c0_i32 = arith.constant 0 : i32
    %1 = vector.broadcast %c0_i32 : i32 to vector<2x16xi32>
    %c1_i32 = arith.constant 1 : i32
    %2 = vector.broadcast %c1_i32 : i32 to vector<2x16xi32>
    %3 = arith.cmpi eq, %0, %2 : vector<2x16xi32>
    %c5_i32 = arith.constant 5 : i32
    %4 = vector.broadcast %c5_i32 : i32 to vector<2x16xi32>
    %5 = arith.cmpi eq, %0, %4 : vector<2x16xi32>
    %6 = arith.ori %3, %5 : vector<2x16xi1>
    %7 = arith.extui %6 : vector<2x16xi1> to vector<2x16xi32>
    %c0_i32_1 = arith.constant 0 : i32
    %8 = vector.broadcast %c0_i32_1 : i32 to vector<2x16xi32>
    %9 = arith.shli %7, %8 : vector<2x16xi32>
    %10 = arith.ori %1, %9 : vector<2x16xi32>
    %c2_i32 = arith.constant 2 : i32
    %11 = vector.broadcast %c2_i32 : i32 to vector<2x16xi32>
    %12 = arith.cmpi eq, %0, %11 : vector<2x16xi32>
    %c6_i32 = arith.constant 6 : i32
    %13 = vector.broadcast %c6_i32 : i32 to vector<2x16xi32>
    %14 = arith.cmpi eq, %0, %13 : vector<2x16xi32>
    %15 = arith.ori %12, %14 : vector<2x16xi1>
    %16 = arith.extui %15 : vector<2x16xi1> to vector<2x16xi32>
    %c8_i32 = arith.constant 8 : i32
    %17 = vector.broadcast %c8_i32 : i32 to vector<2x16xi32>
    %18 = arith.shli %16, %17 : vector<2x16xi32>
    %19 = arith.ori %10, %18 : vector<2x16xi32>
    %c3_i32 = arith.constant 3 : i32
    %20 = vector.broadcast %c3_i32 : i32 to vector<2x16xi32>
    %21 = arith.cmpi eq, %0, %20 : vector<2x16xi32>
    %c7_i32 = arith.constant 7 : i32
    %22 = vector.broadcast %c7_i32 : i32 to vector<2x16xi32>
    %23 = arith.cmpi eq, %0, %22 : vector<2x16xi32>
    %24 = arith.ori %21, %23 : vector<2x16xi1>
    %25 = arith.extui %24 : vector<2x16xi1> to vector<2x16xi32>
    %c16_i32 = arith.constant 16 : i32
    %26 = vector.broadcast %c16_i32 : i32 to vector<2x16xi32>
    %27 = arith.shli %25, %26 : vector<2x16xi32>
    %28 = arith.ori %19, %27 : vector<2x16xi32>
    %c4_i32 = arith.constant 4 : i32
    %29 = vector.broadcast %c4_i32 : i32 to vector<2x16xi32>
    %30 = arith.cmpi eq, %0, %29 : vector<2x16xi32>
    %c8_i32_2 = arith.constant 8 : i32
    %31 = vector.broadcast %c8_i32_2 : i32 to vector<2x16xi32>
    %32 = arith.cmpi eq, %0, %31 : vector<2x16xi32>
    %33 = arith.ori %30, %32 : vector<2x16xi1>
    %34 = arith.extui %33 : vector<2x16xi1> to vector<2x16xi32>
    %c24_i32 = arith.constant 24 : i32
    %35 = vector.broadcast %c24_i32 : i32 to vector<2x16xi32>
    %36 = arith.shli %34, %35 : vector<2x16xi32>
    %37 = arith.ori %28, %36 : vector<2x16xi32>
    %c0_3 = arith.constant 0 : index
    %c0_4 = arith.constant 0 : index
    %38 = vector.load %arg3[%c0_3, %c0_4] : memref<2x16xi32, #tpu.memory_space<vmem>>, vector<2x16xi32>
    tpu.vector_store %arg3[%c0_3, %c0_4], %37 {strides = array<i32>} : memref<2x16xi32, #tpu.memory_space<vmem>>, vector<2x16xi32>,
    return
  }
  func.func @transform_0(%arg0: i32, %arg1: i32) -> (i32, i32) {
    %c0_i32 = arith.constant 0 : i32
    return %arg0, %arg1 : i32, i32
  }
  func.func @transform_1(%arg0: i32, %arg1: i32) -> (i32, i32) {
    %c0_i32 = arith.constant 0 : i32
    return %arg0, %arg1 : i32, i32
  }
}

</mosaic_0001>

<bundles_post_ra>
// kernel: preprocessor_forward.1
= control target key start
LH: loop header
LB: loop body
LE: loop exit
PB: predicated region body
PF: predicated region fallthrough
CT: control target
= control target key end

     0   :  { %6 = vsyncpa [#allocation3], 0  ;;  %s74_s6 = smov [#allocation2]   ;;  %s92_s0 = inlined_call_operand.hbm [shape: s32[2,16], index: 0, kind: input, shape index: {}]   ;;  %s93_s1 = inlined_call_operand.vmem [shape: s32[2,16], index: 1, kind: output, shape index: {}]  }
   0x1   :  { %s13_s7 = sshll.u32 %s74_s6, 4  ;;  %s14_s7 = int_to_ptr.vmem [resolvable:$true] %s13_s7 }
   0x2   :  { %s60_s8 = scalar_lea.vmem %s14_s7, 32  ;;  %p65_p1 = scmp.lt.s32.totalorder %s14_s7, %s14_s7 }
   0x3   :  { %p61_p0 = scmp.ne.s32.totalorder %s14_s7, %s60_s8  ;;  %p66_p2 = scmp.lt.s32.totalorder %s60_s8, %s60_s8 }
   0x5   :  { %p67_p3 = por %p66_p2, %p65_p1 }
   0x7   :  { %p68_p4 = pnand %p67_p3, %p61_p0 }
   0x9   :  { %71 = shalt.err (!%p68_p4)
}
   0xa   :  { %16 = dma.hbm_to_vmem [thread:$0]  %s92_s0, 32, %s14_s7, [#allocation3]  }
   0xb   :  { %72 = dma.done.wait [#allocation3], 32  }
   0xc   :  { %73 = vsyncadd [#allocation3], 4294967264  ;;  %v20_v0 = vld [vmem:[#allocation2] sm:$0x3]  ;;  %v75_v1 = vmov 0   ;;  %vm43_vm12 = vcmask 123904  }
   0xd   :  { %vm21_vm0 = vcmp.eq.s32.totalorder %v20_v0, 1  ;;  %vm22_vm1 = vcmp.eq.s32.totalorder %v20_v0, 5  ;;  %vm25_vm2 = vcmp.eq.s32.totalorder %v20_v0, 2  ;;  %vm26_vm3 = vcmp.eq.s32.totalorder %v20_v0, 6 }
   0xe   :  { %vm23_vm4 = vmor %vm21_vm0, %vm22_vm1  ;;  %vm31_vm5 = vcmp.eq.s32.totalorder %v20_v0, 3  ;;  %vm32_vm6 = vcmp.eq.s32.totalorder %v20_v0, 7  ;;  %vm37_vm7 = vcmp.eq.s32.totalorder %v20_v0, 4  ;;  %vm38_vm8 = vcmp.eq.s32.totalorder %v20_v0, 8 }
   0xf   :  { %vm27_vm9 = vmor %vm25_vm2, %vm26_vm3  ;;  %v24_v2 = vsel %vm23_vm4, 1, %v75_v1 }
  0x10   :  { %v28_v3 = vsel %vm27_vm9, 1, %v75_v1  ;;  %vm33_vm10 = vmor %vm31_vm5, %vm32_vm6 }
  0x11   :  { %v29_v4 = vshll.u32 %v28_v3, 8  ;;  %v34_v5 = vsel %vm33_vm10, 1, %v75_v1  ;;  %vm39_vm11 = vmor %vm37_vm7, %vm38_vm8 }
  0x12   :  { %v35_v6 = vshll.u32 %v34_v5, 16  ;;  %v40_v7 = vsel %vm39_vm11, 1, %v75_v1 }
  0x13   :  { %v30_v8 = vor.u32 %v29_v4, %v24_v2  ;;  %v41_v9 = vshll.u32 %v40_v7, 24 }
  0x15   :  { %v36_v10 = vor.u32 %v35_v6, %v30_v8 }
  0x17   :  { %v42_v11 = vor.u32 %v41_v9, %v36_v10 }
  0x19   :  { %44 = vst.msk [vmem:[%s93_s1] sm:$0x3] %vm43_vm12, %v42_v11 }
  0x1a   :  { %49 = vsyncpa [#allocation3], 1 }

</bundles_post_ra>
